<compile_context>
chip_gen: v6e
topology: v6e:2x2x1
jax: 0.10.0
libtpu: 0.0.40
codegen_flags: <defaults>
</compile_context>

<pallas_src>
import functools

import jax
import jax.numpy as jnp
from jax.experimental import pallas as pl
from jax.experimental.pallas import tpu as pltpu


def _round_up(n, m):
    return ((n + m - 1) // m) * m


def policy_kernel(x_ref, w1_ref, b1_ref, w2_ref, b2_ref, out_ref):
    # linear1 + ReLU (MXU matmul, f32 accumulation). b1 is (1, hidden).
    h = jnp.dot(x_ref[...], w1_ref[...], preferred_element_type=jnp.float32)
    h = jnp.maximum(h + b1_ref[...], 0.0)

    # linear2 into a lane-dense (tb, a_pad) logits slab. Padded action
    # columns already carry a -1e30 bias (set in the wrapper), so the softmax
    # reductions ignore them with no extra masking work here.
    h = h.astype(w2_ref.dtype)                      # bf16 path: keep MXU uniform
    logits = jnp.dot(h, w2_ref[...], preferred_element_type=jnp.float32)
    logits = logits + b2_ref[...]                   # b2 is (1, a_pad), f32

    # Numerically stable softmax over the (padded) action axis.
    m = jnp.max(logits, axis=-1, keepdims=True)
    e = jnp.exp(logits - m)
    s = jnp.sum(e, axis=-1, keepdims=True)
    inv = pl.reciprocal(s, approx=True)             # EUP slot (otherwise idle)
    inv = inv * (2.0 - s * inv)                     # one Newton step -> f32 accuracy
    probs = e * inv

    # Store only the real action columns -- HBM output is (tb, num_actions).
    na = out_ref.shape[1]
    out_ref[...] = probs[:, :na].astype(out_ref.dtype)


def _choose_tb(batch, max_tb=1024):
    # >= 2 tiles when the batch allows (v7x has 2 TCs), tiles capped at max_tb,
    # and batch padding waste kept below one tile.
    n_tiles = max(2, pl.cdiv(batch, max_tb))
    return _round_up(pl.cdiv(batch, n_tiles), 8)


def policy_forward(x, w1, b1, w2, b2, *, block_batch=None, use_bf16=False):
    batch, num_inputs = x.shape
    hidden = w1.shape[1]
    num_actions = w2.shape[1]

    # Lane-dense compute slab: pad the action axis to a multiple of 128.
    a_pad = _round_up(max(num_actions, 128), 128)

    tb = _round_up(block_batch, 8) if block_batch is not None else _choose_tb(batch)
    batch_pad = _round_up(batch, tb)

    # Pad once at the call boundary (no-ops when already aligned).
    xp = jnp.pad(x, ((0, batch_pad - batch), (0, 0)))
    w2p = jnp.pad(w2, ((0, 0), (0, a_pad - num_actions)))
    # Padded w2 columns are zero, so a -1e30 bias masks the padded logits for
    # free (kept in f32 even on the bf16 path so it stays representable).
    b2p = jnp.pad(b2.astype(jnp.float32), ((0, 0), (0, a_pad - num_actions)),
                  constant_values=-1e30)
    b1f = b1.astype(jnp.float32)

    if use_bf16:
        # Halve the dominant HBM read and run the MXU at bf16 rate on v6e/v7x.
        xp = xp.astype(jnp.bfloat16)
        w1 = w1.astype(jnp.bfloat16)
        w2p = w2p.astype(jnp.bfloat16)

    grid = (batch_pad // tb,)

    out = pl.pallas_call(
        policy_kernel,
        out_shape=jax.ShapeDtypeStruct((batch_pad, num_actions), jnp.float32),
        grid_spec=pltpu.PrefetchScalarGridSpec(
            num_scalar_prefetch=0,
            grid=grid,
            in_specs=[
                pl.BlockSpec((tb, num_inputs), lambda i: (i, 0)),       # x: tiled on batch
                pl.BlockSpec((num_inputs, hidden), lambda i: (0, 0)),   # w1: resident
                pl.BlockSpec((1, hidden), lambda i: (0, 0)),            # b1: resident
                pl.BlockSpec((hidden, a_pad), lambda i: (0, 0)),        # w2: resident
                pl.BlockSpec((1, a_pad), lambda i: (0, 0)),             # b2: resident
            ],
            out_specs=pl.BlockSpec((tb, num_actions), lambda i: (i, 0)),
        ),
        compiler_params=pltpu.CompilerParams(
            dimension_semantics=("parallel",),   # v7x: shard batch tiles across both TCs
        ),
    )(xp, w1, b1f, w2p, b2p)

    # Only the batch-padding rows are trimmed (no padded action columns ever
    # reach HBM); skip the slice entirely when the batch was already aligned.
    return out if batch_pad == batch else out[:batch]


def policy_forward_ref(x, w1, b1, w2, b2):
    h = jnp.maximum(x @ w1 + b1, 0.0)
    logits = h @ w2 + b2
    return jax.nn.softmax(logits, axis=1)


if __name__ == "__main__":
    batch = 2
    num_inputs = 16
    hidden_size = 32
    num_actions = 4

    key = jax.random.PRNGKey(0)
    k1, k2, k3, k4, k5 = jax.random.split(key, 5)
    # Deterministic synthetic parameters (nn.Linear-like scale).
    w1 = jax.random.uniform(k1, (num_inputs, hidden_size), jnp.float32,
                            minval=-1.0, maxval=1.0) / jnp.sqrt(num_inputs)
    b1 = jax.random.uniform(k2, (1, hidden_size), jnp.float32,
                            minval=-1.0, maxval=1.0) / jnp.sqrt(num_inputs)
    w2 = jax.random.uniform(k3, (hidden_size, num_actions), jnp.float32,
                            minval=-1.0, maxval=1.0) / jnp.sqrt(hidden_size)
    b2 = jax.random.uniform(k4, (1, num_actions), jnp.float32,
                            minval=-1.0, maxval=1.0) / jnp.sqrt(hidden_size)
    x = jax.random.normal(k5, (batch, num_inputs), jnp.float32)

    # Small-batch path (batch=2 pads to one 8-row tile, grid=(1,)).
    probs = policy_forward(x, w1, b1, w2, b2)
    jax.block_until_ready(probs)
    ref = policy_forward_ref(x, w1, b1, w2, b2)
    assert probs.shape == (batch, num_actions)
    assert jnp.allclose(probs, ref, atol=1e-5, rtol=1e-5)
    assert jnp.allclose(jnp.sum(probs, axis=1), 1.0, atol=1e-5)

    # Multi-tile path: default tb selection gives >= 2 tiles (256-row tiles,
    # grid=(2,)), exercising resident-weight index_maps and the trimmed
    # batch-padding slice (500 -> 512 rows).
    xb = jax.random.normal(jax.random.PRNGKey(1), (500, num_inputs), jnp.float32)
    probs_b = policy_forward(xb, w1, b1, w2, b2)
    jax.block_until_ready(probs_b)
    ref_b = policy_forward_ref(xb, w1, b1, w2, b2)
    assert probs_b.shape == (500, num_actions)
    assert jnp.allclose(probs_b, ref_b, atol=1e-5, rtol=1e-5)
    assert jnp.allclose(jnp.sum(probs_b, axis=1), 1.0, atol=1e-5)

    # Explicit small tile override (grid=(4,)) still matches.
    probs_c = policy_forward(xb, w1, b1, w2, b2, block_batch=128)
    jax.block_until_ready(probs_c)
    assert jnp.allclose(probs_c, ref_b, atol=1e-5, rtol=1e-5)

    # bf16 bandwidth path (v6e/v7x): looser tolerance, same semantics.
    probs_bf = policy_forward(xb, w1, b1, w2, b2, use_bf16=True)
    jax.block_until_ready(probs_bf)
    assert jnp.allclose(probs_bf, ref_b, atol=2e-2, rtol=2e-2)
    assert jnp.allclose(jnp.sum(probs_bf, axis=1), 1.0, atol=1e-3)

    # TODO(synk): get_action's numpy-based sampling / log_prob gather (and the Adam
    # optimizer state) is host-side RL glue, not part of the TPU forward hot path;
    # an in-kernel gumbel-argmax sampler (pltpu.prng_seed/prng_random_bits) would be
    # the next step for latency-bound batch-1 inference.
    print("KERNEL_OK")
</pallas_src>

<mosaic_0001>
module attributes {stable_mosaic.version = 11 : i64} {
  func.func @policy_kernel(%arg0: i32, %arg1: memref<8x16xf32, #tpu.memory_space<vmem>>, %arg2: memref<16x32xf32, #tpu.memory_space<vmem>>, %arg3: memref<1x32xf32, #tpu.memory_space<vmem>>, %arg4: memref<32x128xf32, #tpu.memory_space<vmem>>, %arg5: memref<1x128xf32, #tpu.memory_space<vmem>>, %arg6: memref<8x4xf32, #tpu.memory_space<vmem>>) attributes {dimension_semantics = [#tpu.dimension_semantics<parallel>], iteration_bounds = array<i64: 1>, scalar_prefetch = 0 : i64, scratch_operands = 0 : i64, tpu.core_type = #tpu.core_type<tc>, window_params = [{transform_indices = @transform_0, window_bounds = array<i64: 8, 16>}, {pipeline_mode = #tpu.pipeline_mode<synchronous>, transform_indices = @transform_1, window_bounds = array<i64: 16, 32>}, {pipeline_mode = #tpu.pipeline_mode<synchronous>, transform_indices = @transform_2, window_bounds = array<i64: 1, 32>}, {pipeline_mode = #tpu.pipeline_mode<synchronous>, transform_indices = @transform_3, window_bounds = array<i64: 32, 128>}, {pipeline_mode = #tpu.pipeline_mode<synchronous>, transform_indices = @transform_4, window_bounds = array<i64: 1, 128>}, {transform_indices = @transform_5, window_bounds = array<i64: 8, 4>}]} {
    %c0 = arith.constant 0 : index
    %c0_0 = arith.constant 0 : index
    %0 = vector.load %arg1[%c0, %c0_0] : memref<8x16xf32, #tpu.memory_space<vmem>>, vector<8x16xf32>
    %c0_1 = arith.constant 0 : index
    %c0_2 = arith.constant 0 : index
    %1 = vector.load %arg2[%c0_1, %c0_2] : memref<16x32xf32, #tpu.memory_space<vmem>>, vector<16x32xf32>
    %cst = arith.constant dense<0.000000e+00> : vector<8x32xf32>
    %2 = tpu.matmul %0, %1, %cst {dimension_numbers = #tpu.dot_dimension_numbers<[1], [0], [0], [1], [0, 0, 1, 1], [], []>} : vector<8x16xf32>, vector<16x32xf32>, vector<8x32xf32> -> vector<8x32xf32>
    %c0_3 = arith.constant 0 : index
    %c0_4 = arith.constant 0 : index
    %3 = vector.load %arg3[%c0_3, %c0_4] : memref<1x32xf32, #tpu.memory_space<vmem>>, vector<1x32xf32>
    %4 = vector.broadcast %3 : vector<1x32xf32> to vector<8x32xf32>
    %5 = arith.addf %2, %4 : vector<8x32xf32>
    %cst_5 = arith.constant 0.000000e+00 : f32
    %6 = vector.broadcast %cst_5 : f32 to vector<8x32xf32>
    %7 = arith.maximumf %5, %6 : vector<8x32xf32>
    %c0_6 = arith.constant 0 : index
    %c0_7 = arith.constant 0 : index
    %8 = vector.load %arg4[%c0_6, %c0_7] : memref<32x128xf32, #tpu.memory_space<vmem>>, vector<32x128xf32>
    %cst_8 = arith.constant dense<0.000000e+00> : vector<8x128xf32>
    %9 = tpu.matmul %7, %8, %cst_8 {dimension_numbers = #tpu.dot_dimension_numbers<[1], [0], [0], [1], [0, 0, 1, 1], [], []>} : vector<8x32xf32>, vector<32x128xf32>, vector<8x128xf32> -> vector<8x128xf32>
    %c0_9 = arith.constant 0 : index
    %c0_10 = arith.constant 0 : index
    %10 = vector.load %arg5[%c0_9, %c0_10] : memref<1x128xf32, #tpu.memory_space<vmem>>, vector<1x128xf32>
    %11 = vector.broadcast %10 : vector<1x128xf32> to vector<8x128xf32>
    %12 = arith.addf %9, %11 : vector<8x128xf32>
    %cst_11 = arith.constant dense<0xFF800000> : vector<8xf32>
    %13 = vector.multi_reduction <maximumf>, %12, %cst_11 [1] : vector<8x128xf32> to vector<8xf32>
    %14 = vector.shape_cast %13 : vector<8xf32> to vector<8x1xf32>
    %15 = vector.broadcast %14 : vector<8x1xf32> to vector<8x128xf32>
    %16 = arith.subf %12, %15 : vector<8x128xf32>
    %17 = math.exp %16 : vector<8x128xf32>
    %cst_12 = arith.constant dense<0.000000e+00> : vector<8xf32>
    %18 = vector.multi_reduction <add>, %17, %cst_12 [1] : vector<8x128xf32> to vector<8xf32>
    %19 = vector.shape_cast %18 : vector<8xf32> to vector<8x1xf32>
    %20 = tpu.reciprocal %19 {approx = true} : vector<8x1xf32> -> vector<8x1xf32>
    %21 = arith.mulf %19, %20 : vector<8x1xf32>
    %cst_13 = arith.constant 2.000000e+00 : f32
    %22 = vector.broadcast %cst_13 : f32 to vector<8x1xf32>
    %23 = arith.subf %22, %21 : vector<8x1xf32>
    %24 = arith.mulf %20, %23 : vector<8x1xf32>
    %25 = vector.broadcast %24 : vector<8x1xf32> to vector<8x128xf32>
    %26 = arith.mulf %17, %25 : vector<8x128xf32>
    %27 = vector.extract_strided_slice %26 {offsets = [0, 0], sizes = [8, 4], strides = [1, 1]} : vector<8x128xf32> to vector<8x4xf32>
    %c0_14 = arith.constant 0 : index
    %c0_15 = arith.constant 0 : index
    %28 = vector.load %arg6[%c0_14, %c0_15] : memref<8x4xf32, #tpu.memory_space<vmem>>, vector<8x4xf32>
    tpu.vector_store %arg6[%c0_14, %c0_15], %27 {strides = array<i32>} : memref<8x4xf32, #tpu.memory_space<vmem>>, vector<8x4xf32>,
    return
  }
  func.func @transform_0(%arg0: i32) -> (i32, i32) {
    %c0_i32 = arith.constant 0 : i32
    %c0_i32_0 = arith.constant 0 : i32
    return %arg0, %c0_i32 : i32, i32
  }
  func.func @transform_1(%arg0: i32) -> (i32, i32) {
    %c0_i32 = arith.constant 0 : i32
    %c0_i32_0 = arith.constant 0 : i32
    %c0_i32_1 = arith.constant 0 : i32
    return %c0_i32, %c0_i32_0 : i32, i32
  }
  func.func @transform_2(%arg0: i32) -> (i32, i32) {
    %c0_i32 = arith.constant 0 : i32
    %c0_i32_0 = arith.constant 0 : i32
    %c0_i32_1 = arith.constant 0 : i32
    return %c0_i32, %c0_i32_0 : i32, i32
  }
  func.func @transform_3(%arg0: i32) -> (i32, i32) {
    %c0_i32 = arith.constant 0 : i32
    %c0_i32_0 = arith.constant 0 : i32
    %c0_i32_1 = arith.constant 0 : i32
    return %c0_i32, %c0_i32_0 : i32, i32
  }
  func.func @transform_4(%arg0: i32) -> (i32, i32) {
    %c0_i32 = arith.constant 0 : i32
    %c0_i32_0 = arith.constant 0 : i32
    %c0_i32_1 = arith.constant 0 : i32
    return %c0_i32, %c0_i32_0 : i32, i32
  }
  func.func @transform_5(%arg0: i32) -> (i32, i32) {
    %c0_i32 = arith.constant 0 : i32
    %c0_i32_0 = arith.constant 0 : i32
    return %arg0, %c0_i32 : i32, i32
  }
}

</mosaic_0001>

<bundles_post_ra>
// kernel: tpu_custom_call.1
= control target key start
LH: loop header
LB: loop body
LE: loop exit
PB: predicated region body
PF: predicated region fallthrough
CT: control target
= control target key end

     0   :  { %10 = vsyncpa [#allocation3], 0  ;;  %s409_s0 = inlined_call_operand.hbm [shape: f32[8,16], index: 0, kind: input, shape index: {}]   ;;  %s410_s1 = inlined_call_operand.hbm [shape: f32[16,32], index: 1, kind: input, shape index: {}]   ;;  %s411_s2 = inlined_call_operand.vmem [shape: f32[1,32], index: 2, kind: input, shape index: {}]   ;;  %s412_s3 = inlined_call_operand.hbm [shape: f32[32,128], index: 3, kind: input, shape index: {}]   ;;  %s413_s4 = inlined_call_operand.vmem [shape: f32[1,128], index: 4, kind: input, shape index: {}]   ;;  %s414_s5 = inlined_call_operand.vmem [shape: f32[8,4], index: 5, kind: output, shape index: {}]  }
   0x1   :  { %11 = vsyncpa [#allocation5], 0  ;;  %s354_s18 = smov [#allocation4]  }
   0x2   :  { %s27_s19 = sshll.u32 %s354_s18, 4  ;;  %s28_s19 = int_to_ptr.vmem [resolvable:$true] %s27_s19 }
   0x3   :  { %s298_s20 = scalar_lea.vmem %s28_s19, 256  ;;  %p303_p1 = scmp.lt.s32.totalorder %s28_s19, %s28_s19 }
   0x4   :  { %p299_p0 = scmp.ne.s32.totalorder %s28_s19, %s298_s20  ;;  %p304_p2 = scmp.lt.s32.totalorder %s298_s20, %s298_s20 }
   0x6   :  { %p305_p3 = por %p304_p2, %p303_p1 }
   0x8   :  { %p306_p4 = pnand %p305_p3, %p299_p0 }
   0xa   :  { %309 = shalt.err (!%p306_p4)
}
   0xb   :  { %s355_s21 = smov 128   ;;  %s356_s22 = smov 8  }
   0xc   :  { %33 = dma.hbm_to_vmem [thread:$0]  %s410_s1, 256, %s28_s19, [#allocation5], %s355_s21, %s355_s21, %s356_s22  }
   0xd   :  { %s357_s25 = smov [#allocation2]   ;;  %s358_s27 = smov [#allocation6]  }
   0xe   :  { %s18_s26 = sshll.u32 %s357_s25, 4  ;;  %s41_s28 = sshll.u32 %s358_s27, 4  ;;  %s19_s26 = int_to_ptr.vmem [resolvable:$true] %s18_s26  ;;  %s42_s28 = int_to_ptr.vmem [resolvable:$true] %s41_s28 }
   0xf   :  { %s318_s29 = scalar_lea.vmem %s19_s26, 128  ;;  %p323_p6 = scmp.lt.s32.totalorder %s19_s26, %s19_s26 }
  0x10   :  { %p319_p5 = scmp.ne.s32.totalorder %s19_s26, %s318_s29  ;;  %p324_p7 = scmp.lt.s32.totalorder %s318_s29, %s318_s29 }
  0x12   :  { %p325_p8 = por %p324_p7, %p323_p6 }
  0x14   :  { %p326_p9 = pnand %p325_p8, %p319_p5 }
  0x16   :  { %329 = shalt.err (!%p326_p9)
}
  0x17   :  { %21 = dma.hbm_to_vmem [thread:$0]  %s409_s0, 128, %s19_s26, [#allocation3]  }
  0x18   :  { %s338_s7 = scalar_lea.vmem %s42_s28, 512  ;;  %p343_p11 = scmp.lt.s32.totalorder %s42_s28, %s42_s28 }
  0x19   :  { %p339_p10 = scmp.ne.s32.totalorder %s42_s28, %s338_s7  ;;  %p344_p12 = scmp.lt.s32.totalorder %s338_s7, %s338_s7 }
  0x1b   :  { %p345_p13 = por %p344_p12, %p343_p11 }
  0x1d   :  { %p346_p0 = pnand %p345_p13, %p339_p10 }
  0x1f   :  { %349 = shalt.err (!%p346_p0)
}
  0x20   :  { %47 = dma.hbm_to_vmem [thread:$0]  %s412_s3, 512, %s42_s28, [#allocation5], %s355_s21, %s355_s21, %s356_s22  }
  0x21   :  { %350 = dma.done.wait [#allocation3], 128  }
  0x22   :  { %351 = vsyncadd [#allocation3], 4294967168 }
  0x23   :  { %352 = dma.done.wait [#allocation5], 768  }
  0x24   :  { %353 = vsyncadd [#allocation5], 4294966528  ;;  %v359_v0 = vmov 0.0   ;;  %vm360_vm0 = vmmov 0   ;;  %v61_v1 = vld [vmem:[#allocation4 + $0x8] sm:$0xff]  ;;  %v60_v2 = vld [vmem:[#allocation4] sm:$0xff] }
  0x25   :  { %261 = vmatprep.subr.mxu0 %v359_v0  ;;  %265 = vmatprep.mubr.msk.f32.mxu0 %vm360_vm0, %v359_v0  ;;  %v59_v3 = vld [vmem:[#allocation2] sm:$0xff]  ;;  %vm69_vm1 = vcmask 130048   ;;  %v147_v4 = vld [vmem:[#allocation6 + $0x18] sm:$0xff]  ;;  %v146_v5 = vld [vmem:[#allocation6 + $0x10] sm:$0xff]  ;;  %vm155_vm2 = vcmask 261120   ;;  %vm241_vm3 = vcmask 31744  }
  0x26   :  { %268 = vmatprep.subr.mxu1 %v359_v0  ;;  %276 = vmatprep.mubr.msk.f32.mxu1 %vm360_vm0, %v359_v0  ;;  %v145_v6 = vld [vmem:[#allocation6 + $0x8] sm:$0xff]  ;;  %v144_v7 = vld [vmem:[#allocation6] sm:$0xff] }
  0x27   :  { %262 = vmatpush3.msra.mxu0 %v61_v1  ;;  %269 = vmatpush3.msra.mxu1 %v147_v4  ;;  %v249_v8 = vld [vmem:[%s411_s2] ss:$0 sm:$0xff] }
  0x28   :  { %263 = vmatprep.subr.mxu0 %v359_v0  ;;  %270 = vmatprep.subr.mxu1 %v359_v0  ;;  %v251_v13 = vld [vmem:[%s413_s4] ss:$0 sm:$0xff] }
  0x29   :  { %264 = vmatpush3.msra.mxu0 %v60_v2  ;;  %271 = vmatpush3.msra.mxu1 %v146_v5 }
  0x2a   :  { %266 = vmatmul.mubr.msk.f32.vlgmr.msra.gmra.mxu0 %vm69_vm1, %v59_v3  ;;  %272 = vmatprep.subr.mxu1 %v359_v0 }
  0x2b   :  { %273 = vmatpush3.msra.mxu1 %v145_v6 }
  0x2c   :  { %274 = vmatprep.subr.mxu1 %v359_v0 }
  0x2d   :  { %275 = vmatpush3.msra.mxu1 %v144_v7 }
  0xea   :  { %v139_v9 = vpop.f32.mrf.mxu0 }
  0xeb   :  { %v140_v10 = vadd.f32 %v249_v8, %v139_v9 }
  0xec   :  { %v267_v11 = vpop.f32.mrf.mxu0 }
  0xed   :  { %v143_v12 = vmax.f32 %v140_v10, 0.0 }
  0xef   :  { %277 = vmatmul.mubr.msk.f32.vlgmr.msra.gmra.mxu1 %vm155_vm2, %v143_v12 }
 0x1af   :  { %v225_v14 = vpop.f32.mrf.mxu1 }
 0x1b0   :  { %v226_v15 = vadd.f32 %v251_v13, %v225_v14 }
 0x1b1   :  { %v278_v16 = vpop.f32.mrf.mxu1 }
 0x1b2   :  { %229 = vmax.xlane.f32.xlu0 %v226_v15 }
 0x23b   :  { %v230_v17 = vpop.xlane.xlu0 %229 }
 0x23c   :  { %v231_v18 = vsub.f32 %v226_v15, %v230_v17 }
 0x23e   :  { %v232_v19 = vmul.f32 1.442695, %v231_v18 }
 0x240   :  { %286 = vpow2.f32 %v232_v19 }
 0x24d   :  { %v287_v20 = vpop.eup %286 }
 0x24e   :  { %234 = vadd.xlane.f32.xlu0 %v287_v20 }
 0x2d7   :  { %v235_v21 = vpop.xlane.xlu0 %234 }
 0x2d8   :  { %288 = vrcp.f32 %v235_v21 }
 0x2e5   :  { %v289_v22 = vpop.eup %288 }
 0x2e6   :  { %v237_v23 = vmul.f32 %v289_v22, %v235_v21 }
 0x2e8   :  { %v238_v24 = vsub.f32 2.0, %v237_v23 }
 0x2ea   :  { %v239_v25 = vmul.f32 %v289_v22, %v238_v24 }
 0x2ec   :  { %v240_v26 = vmul.f32 %v287_v20, %v239_v25 }
 0x2ee   :  { %242 = vst.msk [vmem:[%s414_s5] sm:$0xff] %vm241_vm3, %v240_v26 }
 0x2ef   :  { %247 = vsyncpa [#allocation3], 1 }
 0x2f0   :  { %248 = vsyncpa [#allocation5], 1 }

</bundles_post_ra>
